<compile_context>
chip_gen: v7x
topology: tpu7x:2x2x1
jax: 0.10.0
libtpu: 0.0.40
codegen_flags: <defaults>
</compile_context>

<pallas_src>
import math

import jax
import jax.numpy as jnp
from jax import lax
from jax.experimental import pallas as pl
from jax.experimental.pallas import tpu as pltpu  # noqa: F401  (TPU backend module)

HIDDEN = 64
INPUT = 64
BATCH = 2
DROPOUT_P = 0.1
LN_EPS = 1e-5
# keep iff uniform uint32 < (1 - p) * 2^32
KEEP_THRESHOLD = int((1.0 - DROPOUT_P) * (2 ** 32))


def attn_kernel(qk_ref, gamma_ref, beta_ref, bits_ref, x2_ref, o_ref):
    # One LayerNorm pass over the stacked (2H, I) = (128, 64) tile (q rows then k rows).
    stacked = qk_ref[...]
    mu = jnp.mean(stacked, axis=-1, keepdims=True)
    var = jnp.mean((stacked - mu) ** 2, axis=-1, keepdims=True)
    normed = (stacked - mu) * lax.rsqrt(var + LN_EPS) * gamma_ref[...] + beta_ref[...]
    qn = normed[:HIDDEN, :]       # static slices on sublane boundaries: free
    kn = normed[HIDDEN:, :]

    # q @ k^T without materializing the transpose: contract last dims of both operands.
    qk = lax.dot_general(
        qn, kn,
        dimension_numbers=(((1,), (1,)), ((), ())),
        preferred_element_type=jnp.float32,
    )
    qk = qk * (1.0 / math.sqrt(INPUT))

    # Numerically-stable softmax; fold the 1/(1-p) dropout scale into the normalization.
    m = jnp.max(qk, axis=-1, keepdims=True)
    e = jnp.exp(qk - m)
    scale = 1.0 / (jnp.sum(e, axis=-1, keepdims=True) * (1.0 - DROPOUT_P))

    # Dropout: integer threshold compare on pre-generated random bits (no float convert).
    keep = bits_ref[...] < jnp.asarray(KEEP_THRESHOLD, dtype=jnp.uint32)
    p_drop = jnp.where(keep, e * scale, 0.0)

    # (H, I) x (I, B*D) -> lane-dense (64, 128) output, single MXU matmul.
    o_ref[...] = jnp.dot(p_drop, x2_ref[...], preferred_element_type=jnp.float32)


def model_forward(q_param, k_param, ln_gamma, ln_beta, x2, dropout_key):
    # Stack q and k so LayerNorm runs once over a full 128-sublane tile.
    qk_stacked = jnp.concatenate([q_param, k_param], axis=0).astype(jnp.float32)  # (2H, I)
    # gamma/beta apply over the last (INPUT) axis, matching nn.LayerNorm(hidden) on (H, I)
    # (valid because HIDDEN == INPUT == 64, as in the PyTorch model).
    gamma2d = ln_gamma.reshape(1, INPUT).astype(jnp.float32)
    beta2d = ln_beta.reshape(1, INPUT).astype(jnp.float32)
    # Dropout random bits generated host-side (portable; torch RNG stream is not reproducible).
    bits = jax.random.bits(dropout_key, (HIDDEN, HIDDEN), dtype=jnp.uint32)
    # Fold batch into the lane dimension: (B, S, D) -> (S, B*D) = (64, 128).
    x2_2d = jnp.transpose(x2, (1, 0, 2)).reshape(INPUT, BATCH * INPUT).astype(jnp.float32)

    out_2d = pl.pallas_call(
        attn_kernel,
        out_shape=jax.ShapeDtypeStruct((HIDDEN, BATCH * INPUT), jnp.float32),
        cost_estimate=pl.CostEstimate(
            flops=2 * HIDDEN * INPUT * INPUT + 2 * HIDDEN * INPUT * BATCH * INPUT,
            transcendentals=HIDDEN * INPUT + 2 * HIDDEN,
            bytes_accessed=4 * (2 * HIDDEN * INPUT + 2 * INPUT + HIDDEN * INPUT
                                + INPUT * BATCH * INPUT + HIDDEN * BATCH * INPUT),
        ),
    )(qk_stacked, gamma2d, beta2d, bits, x2_2d)

    # (H, B*D) -> (B, H, D)
    return out_2d.reshape(HIDDEN, BATCH, INPUT).transpose(1, 0, 2)


if __name__ == "__main__":
    key = jax.random.PRNGKey(0)
    kq, kk, kx1, kx2, kdrop = jax.random.split(key, 5)

    # torch.nn.init.normal_ -> standard normal parameters
    q_param = jax.random.normal(kq, (HIDDEN, INPUT), dtype=jnp.float32)
    k_param = jax.random.normal(kk, (HIDDEN, INPUT), dtype=jnp.float32)
    # LayerNorm default affine params
    ln_gamma = jnp.ones((HIDDEN,), dtype=jnp.float32)
    ln_beta = jnp.zeros((HIDDEN,), dtype=jnp.float32)

    x1 = jax.random.normal(kx1, (BATCH, INPUT, INPUT), dtype=jnp.float32)  # unused, as in torch
    x2 = jax.random.normal(kx2, (BATCH, INPUT, INPUT), dtype=jnp.float32)

    out = model_forward(q_param, k_param, ln_gamma, ln_beta, x2, kdrop)
    out = jax.block_until_ready(out)
    assert out.shape == (BATCH, HIDDEN, INPUT) and out.dtype == jnp.float32
    print("KERNEL_OK")
</pallas_src>

<mosaic_0001>
module attributes {stable_mosaic.version = 11 : i64} {
  func.func @attn_kernel(%arg0: memref<128x64xf32, #tpu.memory_space<vmem>>, %arg1: memref<1x64xf32, #tpu.memory_space<vmem>>, %arg2: memref<1x64xf32, #tpu.memory_space<vmem>>, %arg3: memref<64x64xi32, #tpu.memory_space<vmem>>, %arg4: memref<64x128xf32, #tpu.memory_space<vmem>>, %arg5: memref<64x128xf32, #tpu.memory_space<vmem>>) attributes {dimension_semantics = [], scalar_prefetch = 0 : i64, scratch_operands = 0 : i64, tpu.core_type = #tpu.core_type<tc>} {
    %c0 = arith.constant 0 : index
    %c0_0 = arith.constant 0 : index
    %0 = vector.load %arg0[%c0, %c0_0] : memref<128x64xf32, #tpu.memory_space<vmem>>, vector<128x64xf32>
    %cst = arith.constant dense<0.000000e+00> : vector<128xf32>
    %1 = vector.multi_reduction <add>, %0, %cst [1] : vector<128x64xf32> to vector<128xf32>
    %2 = vector.shape_cast %1 : vector<128xf32> to vector<128x1xf32>
    %cst_1 = arith.constant 6.400000e+01 : f32
    %3 = vector.broadcast %cst_1 : f32 to vector<128x1xf32>
    %4 = arith.divf %2, %3 : vector<128x1xf32>
    %5 = vector.broadcast %4 : vector<128x1xf32> to vector<128x64xf32>
    %6 = arith.subf %0, %5 : vector<128x64xf32>
    %7 = arith.mulf %6, %6 : vector<128x64xf32>
    %cst_2 = arith.constant dense<0.000000e+00> : vector<128xf32>
    %8 = vector.multi_reduction <add>, %7, %cst_2 [1] : vector<128x64xf32> to vector<128xf32>
    %9 = vector.shape_cast %8 : vector<128xf32> to vector<128x1xf32>
    %cst_3 = arith.constant 6.400000e+01 : f32
    %10 = vector.broadcast %cst_3 : f32 to vector<128x1xf32>
    %11 = arith.divf %9, %10 : vector<128x1xf32>
    %12 = vector.broadcast %4 : vector<128x1xf32> to vector<128x64xf32>
    %13 = arith.subf %0, %12 : vector<128x64xf32>
    %cst_4 = arith.constant 9.99999974E-6 : f32
    %14 = vector.broadcast %cst_4 : f32 to vector<128x1xf32>
    %15 = arith.addf %11, %14 : vector<128x1xf32>
    %16 = math.rsqrt %15 : vector<128x1xf32>
    %17 = vector.broadcast %16 : vector<128x1xf32> to vector<128x64xf32>
    %18 = arith.mulf %13, %17 : vector<128x64xf32>
    %c0_5 = arith.constant 0 : index
    %c0_6 = arith.constant 0 : index
    %19 = vector.load %arg1[%c0_5, %c0_6] : memref<1x64xf32, #tpu.memory_space<vmem>>, vector<1x64xf32>
    %20 = vector.broadcast %19 : vector<1x64xf32> to vector<128x64xf32>
    %21 = arith.mulf %18, %20 : vector<128x64xf32>
    %c0_7 = arith.constant 0 : index
    %c0_8 = arith.constant 0 : index
    %22 = vector.load %arg2[%c0_7, %c0_8] : memref<1x64xf32, #tpu.memory_space<vmem>>, vector<1x64xf32>
    %23 = vector.broadcast %22 : vector<1x64xf32> to vector<128x64xf32>
    %24 = arith.addf %21, %23 : vector<128x64xf32>
    %25 = vector.extract_strided_slice %24 {offsets = [0, 0], sizes = [64, 64], strides = [1, 1]} : vector<128x64xf32> to vector<64x64xf32>
    %26 = vector.extract_strided_slice %24 {offsets = [64, 0], sizes = [64, 64], strides = [1, 1]} : vector<128x64xf32> to vector<64x64xf32>
    %cst_9 = arith.constant dense<0.000000e+00> : vector<64x64xf32>
    %27 = tpu.matmul %25, %26, %cst_9 {dimension_numbers = #tpu.dot_dimension_numbers<[1], [1], [0], [0], [0, 0, 1, 0], [], []>} : vector<64x64xf32>, vector<64x64xf32>, vector<64x64xf32> -> vector<64x64xf32>
    %cst_10 = arith.constant 1.250000e-01 : f32
    %28 = vector.broadcast %cst_10 : f32 to vector<64x64xf32>
    %29 = arith.mulf %27, %28 : vector<64x64xf32>
    %cst_11 = arith.constant dense<0xFF800000> : vector<64xf32>
    %30 = vector.multi_reduction <maximumf>, %29, %cst_11 [1] : vector<64x64xf32> to vector<64xf32>
    %31 = vector.shape_cast %30 : vector<64xf32> to vector<64x1xf32>
    %32 = vector.broadcast %31 : vector<64x1xf32> to vector<64x64xf32>
    %33 = arith.subf %29, %32 : vector<64x64xf32>
    %34 = math.exp %33 : vector<64x64xf32>
    %cst_12 = arith.constant dense<0.000000e+00> : vector<64xf32>
    %35 = vector.multi_reduction <add>, %34, %cst_12 [1] : vector<64x64xf32> to vector<64xf32>
    %36 = vector.shape_cast %35 : vector<64xf32> to vector<64x1xf32>
    %cst_13 = arith.constant 0.899999976 : f32
    %37 = vector.broadcast %cst_13 : f32 to vector<64x1xf32>
    %38 = arith.mulf %36, %37 : vector<64x1xf32>
    %cst_14 = arith.constant 1.000000e+00 : f32
    %39 = vector.broadcast %cst_14 : f32 to vector<64x1xf32>
    %40 = arith.divf %39, %38 : vector<64x1xf32>
    %c0_15 = arith.constant 0 : index
    %c0_16 = arith.constant 0 : index
    %41 = vector.load %arg3[%c0_15, %c0_16] : memref<64x64xi32, #tpu.memory_space<vmem>>, vector<64x64xi32>
    %c-429496730_i32 = arith.constant -429496730 : i32
    %42 = vector.broadcast %c-429496730_i32 : i32 to vector<64x64xi32>
    %43 = arith.cmpi ult, %41, %42 : vector<64x64xi32>
    %44 = vector.broadcast %40 : vector<64x1xf32> to vector<64x64xf32>
    %45 = arith.mulf %34, %44 : vector<64x64xf32>
    %cst_17 = arith.constant 0.000000e+00 : f32
    %46 = vector.broadcast %cst_17 : f32 to vector<64x64xf32>
    %47 = arith.select %43, %45, %46 : vector<64x64xi1>, vector<64x64xf32>
    %c0_18 = arith.constant 0 : index
    %c0_19 = arith.constant 0 : index
    %48 = vector.load %arg4[%c0_18, %c0_19] : memref<64x128xf32, #tpu.memory_space<vmem>>, vector<64x128xf32>
    %cst_20 = arith.constant dense<0.000000e+00> : vector<64x128xf32>
    %49 = tpu.matmul %47, %48, %cst_20 {dimension_numbers = #tpu.dot_dimension_numbers<[1], [0], [0], [1], [0, 0, 1, 1], [], []>} : vector<64x64xf32>, vector<64x128xf32>, vector<64x128xf32> -> vector<64x128xf32>
    %c0_21 = arith.constant 0 : index
    %c0_22 = arith.constant 0 : index
    %50 = vector.load %arg5[%c0_21, %c0_22] : memref<64x128xf32, #tpu.memory_space<vmem>>, vector<64x128xf32>
    tpu.vector_store %arg5[%c0_21, %c0_22], %49 {strides = array<i32>} : memref<64x128xf32, #tpu.memory_space<vmem>>, vector<64x128xf32>,
    return
  }
}

</mosaic_0001>

<bundles_post_ra>
// kernel: tpu_custom_call.1
= control target key start
LH: loop header
LB: loop body
LE: loop exit
PB: predicated region body
PF: predicated region fallthrough
CT: control target
= control target key end

     0   :  { %vm37_vm0 = vcmask 523264   ;;  %s1409_s0 = inlined_call_operand.vmem [shape: f32[128,64], index: 0, kind: input, shape index: {}]   ;;  %s1410_s1 = inlined_call_operand.vmem [shape: f32[1,64], index: 1, kind: input, shape index: {}]   ;;  %s1411_s2 = inlined_call_operand.vmem [shape: f32[1,64], index: 2, kind: input, shape index: {}]   ;;  %s1412_s3 = inlined_call_operand.vmem [shape: u32[64,64], index: 3, kind: input, shape index: {}]   ;;  %s1413_s4 = inlined_call_operand.vmem [shape: f32[64,128], index: 4, kind: input, shape index: {}]   ;;  %s1414_s5 = inlined_call_operand.hbm [shape: f32[64,128], index: 5, kind: output, shape index: {}]  }
   0x1   :  { %v29_v0 = vld [vmem:[%s1409_s0 + $0x40] sm:$0xff]  ;;  %v31_v1 = vld [vmem:[%s1409_s0 + $0x50] sm:$0xff]  ;;  %v30_v2 = vld [vmem:[%s1409_s0 + $0x48] sm:$0xff] }
   0x2   :  { %v62_v3 = vsel %vm37_vm0, %v29_v0, 0.0  ;;  %v68_v4 = vsel %vm37_vm0, %v31_v1, 0.0  ;;  %v32_v5 = vld [vmem:[%s1409_s0 + $0x58] sm:$0xff]  ;;  %v65_v6 = vsel %vm37_vm0, %v30_v2, 0.0  ;;  %v33_v8 = vld [vmem:[%s1409_s0 + $0x60] sm:$0xff]  ;;  %v34_v9 = vld [vmem:[%s1409_s0 + $0x68] sm:$0xff] }
   0x3   :  { %63 = vadd.xlane.f32.xlu0 %v62_v3  ;;  %69 = vadd.xlane.f32.xlu1 %v68_v4  ;;  %v71_v7 = vsel %vm37_vm0, %v32_v5, 0.0 }
   0x4   :  { %10 = vsyncpa [#allocation3], 0  ;;  %v74_v10 = vsel %vm37_vm0, %v33_v8, 0.0  ;;  %v77_v11 = vsel %vm37_vm0, %v34_v9, 0.0  ;;  %v1048_v12 = vld [vmem:[%s1409_s0 + $0x70] sm:$0xff]  ;;  %v1053_v13 = vld [vmem:[%s1409_s0 + $0x78] sm:$0xff] }
   0x5   :  { %v80_v14 = vsel %vm37_vm0, %v1048_v12, 0.0  ;;  %v83_v15 = vsel %vm37_vm0, %v1053_v13, 0.0  ;;  %v1062_v16 = vld [vmem:[%s1409_s0] sm:$0xff]  ;;  %v1067_v17 = vld [vmem:[%s1409_s0 + $0x8] sm:$0xff]  ;;  %v1076_v20 = vld [vmem:[%s1409_s0 + $0x10] sm:$0xff] }
   0x6   :  { %v38_v18 = vsel %vm37_vm0, %v1062_v16, 0.0  ;;  %v41_v19 = vsel %vm37_vm0, %v1067_v17, 0.0  ;;  %v1081_v21 = vld [vmem:[%s1409_s0 + $0x18] sm:$0xff]  ;;  %v44_v22 = vsel %vm37_vm0, %v1076_v20, 0.0  ;;  %v1090_v24 = vld [vmem:[%s1409_s0 + $0x20] sm:$0xff]  ;;  %v1095_v25 = vld [vmem:[%s1409_s0 + $0x28] sm:$0xff] }
   0x7   :  { %66 = vadd.xlane.f32.xlu0 %v65_v6  ;;  %72 = vadd.xlane.f32.xlu1 %v71_v7  ;;  %v47_v23 = vsel %vm37_vm0, %v1081_v21, 0.0  ;;  %v50_v26 = vsel %vm37_vm0, %v1090_v24, 0.0  ;;  %v53_v27 = vsel %vm37_vm0, %v1095_v25, 0.0  ;;  %v1104_v28 = vld [vmem:[%s1409_s0 + $0x30] sm:$0xff]  ;;  %v1109_v29 = vld [vmem:[%s1409_s0 + $0x38] sm:$0xff]  ;;  %vm1226_vm1 = vmpackc.low %vm37_vm0, %vm37_vm0 }
   0x8   :  { %v56_v30 = vsel %vm37_vm0, %v1104_v28, 0.0  ;;  %v59_v31 = vsel %vm37_vm0, %v1109_v29, 0.0 }
   0xb   :  { %75 = vadd.xlane.f32.xlu0 %v74_v10  ;;  %78 = vadd.xlane.f32.xlu1 %v77_v11 }
   0xf   :  { %81 = vadd.xlane.f32.xlu0 %v80_v14  ;;  %84 = vadd.xlane.f32.xlu1 %v83_v15 }
  0x13   :  { %39 = vadd.xlane.f32.xlu0 %v38_v18  ;;  %42 = vadd.xlane.f32.xlu1 %v41_v19 }
  0x17   :  { %45 = vadd.xlane.f32.xlu0 %v44_v22  ;;  %48 = vadd.xlane.f32.xlu1 %v47_v23 }
  0x1b   :  { %51 = vadd.xlane.f32.xlu0 %v50_v26  ;;  %54 = vadd.xlane.f32.xlu1 %v53_v27 }
  0x1f   :  { %57 = vadd.xlane.f32.xlu0 %v56_v30  ;;  %60 = vadd.xlane.f32.xlu1 %v59_v31 }
  0x90   :  { %v64_v32 = vpop.xlane.xlu0 %63  ;;  %v70_v33 = vpop.xlane.xlu1 %69 }
  0x91   :  { %v95_v34 = vmul.f32 0.015625, %v64_v32  ;;  %v97_v35 = vmul.f32 0.015625, %v70_v33 }
  0x93   :  { %v1115_v36 = vsub.f32 %v29_v0, %v95_v34  ;;  %v1117_v37 = vsub.f32 %v31_v1, %v97_v35 }
  0x94   :  { %v67_v38 = vpop.xlane.xlu0 %66  ;;  %v73_v39 = vpop.xlane.xlu1 %72 }
  0x95   :  { %v96_v40 = vmul.f32 0.015625, %v67_v38  ;;  %v98_v41 = vmul.f32 0.015625, %v73_v39  ;;  %v127_v42 = vmul.f32 %v1115_v36, %v1115_v36  ;;  %v129_v43 = vmul.f32 %v1117_v37, %v1117_v37 }
  0x97   :  { %v1123_v44 = vsub.f32 %v30_v2, %v96_v40  ;;  %v1125_v45 = vsub.f32 %v32_v5, %v98_v41  ;;  %v159_v46 = vsel %vm37_vm0, %v127_v42, 0.0  ;;  %v165_v49 = vsel %vm37_vm0, %v129_v43, 0.0 }
  0x98   :  { %v76_v47 = vpop.xlane.xlu0 %75  ;;  %160 = vadd.xlane.f32.xlu0 %v159_v46  ;;  %v79_v48 = vpop.xlane.xlu1 %78 }
  0x99   :  { %v99_v50 = vmul.f32 0.015625, %v76_v47  ;;  %v100_v51 = vmul.f32 0.015625, %v79_v48  ;;  %v128_v52 = vmul.f32 %v1123_v44, %v1123_v44  ;;  %v130_v53 = vmul.f32 %v1125_v45, %v1125_v45 }
  0x9b   :  { %v1133_v54 = vsub.f32 %v33_v8, %v99_v50  ;;  %v1135_v55 = vsub.f32 %v34_v9, %v100_v51  ;;  %v162_v56 = vsel %vm37_vm0, %v128_v52, 0.0  ;;  %v168_v59 = vsel %vm37_vm0, %v130_v53, 0.0 }
  0x9c   :  { %v82_v57 = vpop.xlane.xlu0 %81  ;;  %163 = vadd.xlane.f32.xlu1 %v162_v56  ;;  %166 = vadd.xlane.f32.xlu0 %v165_v49  ;;  %v85_v58 = vpop.xlane.xlu1 %84 }
  0x9d   :  { %v101_v60 = vmul.f32 0.015625, %v82_v57  ;;  %v102_v61 = vmul.f32 0.015625, %v85_v58  ;;  %v131_v62 = vmul.f32 %v1133_v54, %v1133_v54  ;;  %v132_v63 = vmul.f32 %v1135_v55, %v1135_v55 }
  0x9f   :  { %v1144_v0 = vsub.f32 %v1048_v12, %v101_v60  ;;  %v1147_v1 = vsub.f32 %v1053_v13, %v102_v61  ;;  %v171_v2 = vsel %vm37_vm0, %v131_v62, 0.0  ;;  %v174_v4 = vsel %vm37_vm0, %v132_v63, 0.0 }
  0xa0   :  { %169 = vadd.xlane.f32.xlu1 %v168_v59  ;;  %172 = vadd.xlane.f32.xlu0 %v171_v2  ;;  %v40_v3 = vpop.xlane.xlu0 %39  ;;  %v43_v5 = vpop.xlane.xlu1 %42 }
  0xa1   :  { %v87_v6 = vmul.f32 0.015625, %v40_v3  ;;  %v88_v7 = vmul.f32 0.015625, %v43_v5  ;;  %v133_v8 = vmul.f32 %v1144_v0, %v1144_v0  ;;  %v134_v9 = vmul.f32 %v1147_v1, %v1147_v1 }
  0xa3   :  { %v1156_v10 = vsub.f32 %v1062_v16, %v87_v6  ;;  %v1159_v11 = vsub.f32 %v1067_v17, %v88_v7  ;;  %v177_v12 = vsel %vm37_vm0, %v133_v8, 0.0  ;;  %v180_v14 = vsel %vm37_vm0, %v134_v9, 0.0 }
  0xa4   :  { %175 = vadd.xlane.f32.xlu1 %v174_v4  ;;  %178 = vadd.xlane.f32.xlu0 %v177_v12  ;;  %v46_v13 = vpop.xlane.xlu0 %45  ;;  %v49_v15 = vpop.xlane.xlu1 %48 }
  0xa5   :  { %v89_v18 = vmul.f32 0.015625, %v46_v13  ;;  %v90_v19 = vmul.f32 0.015625, %v49_v15  ;;  %v119_v22 = vmul.f32 %v1156_v10, %v1156_v10  ;;  %v120_v16 = vmul.f32 %v1159_v11, %v1159_v11 }
  0xa7   :  { %v1168_v23 = vsub.f32 %v1076_v20, %v89_v18  ;;  %v1171_v17 = vsub.f32 %v1081_v21, %v90_v19  ;;  %v135_v26 = vsel %vm37_vm0, %v119_v22, 0.0  ;;  %v138_v30 = vsel %vm37_vm0, %v120_v16, 0.0 }
  0xa8   :  { %181 = vadd.xlane.f32.xlu1 %v180_v14  ;;  %136 = vadd.xlane.f32.xlu0 %v135_v26  ;;  %v52_v27 = vpop.xlane.xlu0 %51  ;;  %v55_v31 = vpop.xlane.xlu1 %54 }
  0xa9   :  { %v91_v32 = vmul.f32 0.015625, %v52_v27  ;;  %v92_v33 = vmul.f32 0.015625, %v55_v31  ;;  %v121_v34 = vmul.f32 %v1168_v23, %v1168_v23  ;;  %v122_v20 = vmul.f32 %v1171_v17, %v1171_v17  ;;  %v1209_v27 = vld [vmem:[%s1410_s1] ss:$0 sm:$0xff] }
  0xab   :  { %v1180_v35 = vsub.f32 %v1090_v24, %v91_v32  ;;  %v1183_v21 = vsub.f32 %v1095_v25, %v92_v33  ;;  %v141_v38 = vsel %vm37_vm0, %v121_v34, 0.0  ;;  %v144_v40 = vsel %vm37_vm0, %v122_v20, 0.0 }
  0xac   :  { %139 = vadd.xlane.f32.xlu1 %v138_v30  ;;  %142 = vadd.xlane.f32.xlu0 %v141_v38  ;;  %v58_v39 = vpop.xlane.xlu0 %57  ;;  %v61_v41 = vpop.xlane.xlu1 %60 }
  0xad   :  { %v93_v42 = vmul.f32 0.015625, %v58_v39  ;;  %v94_v43 = vmul.f32 0.015625, %v61_v41  ;;  %v123_v46 = vmul.f32 %v1180_v35, %v1180_v35  ;;  %v124_v24 = vmul.f32 %v1183_v21, %v1183_v21  ;;  %v1217_v39 = vld [vmem:[%s1411_s2] ss:$0 sm:$0xff] }
  0xaf   :  { %v1192_v47 = vsub.f32 %v1104_v28, %v93_v42  ;;  %v1195_v25 = vsub.f32 %v1109_v29, %v94_v43  ;;  %v147_v48 = vsel %vm37_vm0, %v123_v46, 0.0  ;;  %v150_v49 = vsel %vm37_vm0, %v124_v24, 0.0 }
  0xb0   :  { %145 = vadd.xlane.f32.xlu1 %v144_v40  ;;  %148 = vadd.xlane.f32.xlu0 %v147_v48 }
  0xb1   :  { %v125_v50 = vmul.f32 %v1192_v47, %v1192_v47  ;;  %v126_v51 = vmul.f32 %v1195_v25, %v1195_v25 }
  0xb3   :  { %v153_v52 = vsel %vm37_vm0, %v125_v50, 0.0  ;;  %v156_v28 = vsel %vm37_vm0, %v126_v51, 0.0 }
  0xb4   :  { %151 = vadd.xlane.f32.xlu1 %v150_v49  ;;  %154 = vadd.xlane.f32.xlu0 %v153_v52 }
  0xb8   :  { %157 = vadd.xlane.f32.xlu1 %v156_v28 }
 0x125   :  { %v161_v29 = vpop.xlane.xlu0 %160 }
 0x126   :  { %v191_v53 = vmul.f32 0.015625, %v161_v29 }
 0x128   :  { %v207_v56 = vadd.f32 1e-05, %v191_v53 }
 0x129   :  { %v164_v57 = vpop.xlane.xlu1 %163  ;;  %v167_v58 = vpop.xlane.xlu0 %166 }
 0x12a   :  { %900 = vrsqrt.f32 %v207_v56  ;;  %v192_v59 = vmul.f32 0.015625, %v164_v57  ;;  %v193_v60 = vmul.f32 0.015625, %v167_v58 }
 0x12c   :  { %v208_v61 = vadd.f32 1e-05, %v192_v59  ;;  %v209_v62 = vadd.f32 1e-05, %v193_v60 }
 0x12d   :  { %v170_v63 = vpop.xlane.xlu1 %169  ;;  %v173_v2 = vpop.xlane.xlu0 %172 }
 0x12e   :  { %902 = vrsqrt.f32 %v208_v61  ;;  %v194_v3 = vmul.f32 0.015625, %v170_v63  ;;  %v195_v4 = vmul.f32 0.015625, %v173_v2 }
 0x12f   :  { %904 = vrsqrt.f32 %v209_v62 }
 0x130   :  { %v210_v5 = vadd.f32 1e-05, %v194_v3  ;;  %v211_v6 = vadd.f32 1e-05, %v195_v4 }
 0x131   :  { %v176_v7 = vpop.xlane.xlu1 %175  ;;  %v179_v8 = vpop.xlane.xlu0 %178 }
 0x132   :  { %906 = vrsqrt.f32 %v210_v5  ;;  %v196_v9 = vmul.f32 0.015625, %v176_v7  ;;  %v197_v12 = vmul.f32 0.015625, %v179_v8 }
 0x133   :  { %908 = vrsqrt.f32 %v211_v6 }
 0x134   :  { %v901_v13 = vpop.eup %900  ;;  %v212_v14 = vadd.f32 1e-05, %v196_v9  ;;  %v213_v15 = vadd.f32 1e-05, %v197_v12 }
 0x135   :  { %v182_v18 = vpop.xlane.xlu1 %181  ;;  %v137_v19 = vpop.xlane.xlu0 %136  ;;  %v239_v22 = vmul.f32 %v901_v13, %v1115_v36 }
 0x136   :  { %910 = vrsqrt.f32 %v212_v14  ;;  %v198_v16 = vmul.f32 0.015625, %v182_v18  ;;  %v183_v26 = vmul.f32 0.015625, %v137_v19 }
 0x137   :  { %912 = vrsqrt.f32 %v213_v15  ;;  %v262_v38 = vmul.f32 %v1209_v27, %v239_v22 }
 0x138   :  { %v903_v30 = vpop.eup %902  ;;  %v214_v31 = vadd.f32 1e-05, %v198_v16  ;;  %v199_v32 = vadd.f32 1e-05, %v183_v26 }
 0x139   :  { %v905_v33 = vpop.eup %904  ;;  %v140_v34 = vpop.xlane.xlu1 %139  ;;  %v240_v20 = vmul.f32 %v903_v30, %v1123_v44  ;;  %v285_v44 = vadd.f32 %v1217_v39, %v262_v38 }
 0x13a   :  { %v241_v36 = vmul.f32 %v905_v33, %v1117_v37  ;;  %914 = vrsqrt.f32 %v214_v31  ;;  %v143_v42 = vpop.xlane.xlu0 %142  ;;  %v184_v56 = vmul.f32 0.015625, %v140_v34 }
 0x13b   :  { %916 = vrsqrt.f32 %v199_v32  ;;  %v263_v40 = vmul.f32 %v1209_v27, %v240_v20  ;;  %v185_v58 = vmul.f32 0.015625, %v143_v42 }
 0x13c   :  { %v907_v41 = vpop.eup %906  ;;  %v264_v37 = vmul.f32 %v1209_v27, %v241_v36  ;;  %v200_v4 = vadd.f32 1e-05, %v184_v56 }
 0x13d   :  { %v909_v43 = vpop.eup %908  ;;  %v242_v46 = vmul.f32 %v907_v41, %v1125_v45  ;;  %v286_v24 = vadd.f32 %v1217_v39, %v263_v40  ;;  %v146_v50 = vpop.xlane.xlu1 %145  ;;  %v201_v8 = vadd.f32 1e-05, %v185_v58 }
 0x13e   :  { %v243_v49 = vmul.f32 %v909_v43, %v1133_v54  ;;  %v287_v29 = vadd.f32 %v1217_v39, %v264_v37  ;;  %v149_v57 = vpop.xlane.xlu0 %148  ;;  %v186_v5 = vmul.f32 0.015625, %v146_v50  ;;  %918 = vrsqrt.f32 %v200_v4 }
 0x13f   :  { %v857_v51 = vpack.c.bf16 %v286_v24, %v285_v44  ;;  %v265_v52 = vmul.f32 %v1209_v27, %v242_v46  ;;  %v187_v9 = vmul.f32 0.015625, %v149_v57  ;;  %920 = vrsqrt.f32 %v201_v8 }
 0x140   :  { %v911_v28 = vpop.eup %910  ;;  %v266_v60 = vmul.f32 %v1209_v27, %v243_v49  ;;  %v202_v18 = vadd.f32 1e-05, %v186_v5 }
 0x141   :  { %v244_v45 = vmul.f32 %v911_v28, %v1135_v55  ;;  %859 = vmatprep.subr.msk.bf16.mxu0 %vm1226_vm1, %v857_v51  ;;  %v288_v53 = vadd.f32 %v1217_v39, %v265_v52  ;;  %v913_v54 = vpop.eup %912  ;;  %v152_v2 = vpop.xlane.xlu1 %151 }
 0x142   :  { %862 = vmatpush3.bf16.xpose.msk.msra.mxu0 %vm1226_vm1, %v857_v51  ;;  %v245_v7 = vmul.f32 %v913_v54, %v1144_v0  ;;  %v289_v12 = vadd.f32 %v1217_v39, %v266_v60  ;;  %v155_v13 = vpop.xlane.xlu0 %154  ;;  %v188_v19 = vmul.f32 0.015625, %v152_v2  ;;  %v203_v0 = vadd.f32 1e-05, %v187_v9 }
 0x143   :  { %v863_v59 = vpack.c.bf16 %v288_v53, %v287_v29  ;;  %v267_v61 = vmul.f32 %v1209_v27, %v244_v45  ;;  %v189_v22 = vmul.f32 0.015625, %v155_v13  ;;  %922 = vrsqrt.f32 %v202_v18 }
 0x144   :  { %v915_v55 = vpop.eup %914  ;;  %v268_v26 = vmul.f32 %v1209_v27, %v245_v7  ;;  %v204_v31 = vadd.f32 1e-05, %v188_v19  ;;  %924 = vrsqrt.f32 %v203_v0 }
 0x145   :  { %v917_v62 = vpop.eup %916  ;;  %v246_v63 = vmul.f32 %v915_v55, %v1147_v1  ;;  %865 = vmatprep.subr.msk.bf16.mxu0 %vm1226_vm1, %v863_v59  ;;  %v290_v3 = vadd.f32 %v1217_v39, %v267_v61  ;;  %v158_v16 = vpop.xlane.xlu1 %157  ;;  %v205_v33 = vadd.f32 1e-05, %v189_v22 }
 0x146   :  { %v231_v6 = vmul.f32 %v917_v62, %v1156_v10  ;;  %v190_v32 = vmul.f32 0.015625, %v158_v16  ;;  %v291_v34 = vadd.f32 %v1217_v39, %v268_v26  ;;  %926 = vrsqrt.f32 %v204_v31 }
 0x147   :  { %v869_v1 = vpack.c.bf16 %v290_v3, %v289_v12  ;;  %v269_v15 = vmul.f32 %v1209_v27, %v246_v63  ;;  %928 = vrsqrt.f32 %v205_v33 }
 0x148   :  { %v254_v14 = vmul.f32 %v1209_v27, %v231_v6  ;;  %v206_v38 = vadd.f32 1e-05, %v190_v32  ;;  %v919_v36 = vpop.eup %918 }
 0x149   :  { %v292_v30 = vadd.f32 %v1217_v39, %v269_v15  ;;  %v921_v40 = vpop.eup %920  ;;  %v232_v41 = vmul.f32 %v919_v36, %v1159_v11 }
 0x14a   :  { %868 = vmatpush3.bf16.xpose.msk.msra.mxu0 %vm1226_vm1, %v863_v59  ;;  %v277_v10 = vadd.f32 %v1217_v39, %v254_v14  ;;  %930 = vrsqrt.f32 %v206_v38  ;;  %v233_v43 = vmul.f32 %v921_v40, %v1168_v23 }
 0x14b   :  { %871 = vmatprep.subr.msk.bf16.mxu0 %vm1226_vm1, %v869_v1  ;;  %v875_v20 = vpack.c.bf16 %v292_v30, %v291_v34  ;;  %v255_v44 = vmul.f32 %v1209_v27, %v232_v41 }
 0x14c   :  { %817 = vmatprep.mubr.msk.f32.mxu0 %vm37_vm0, %v277_v10  ;;  %v256_v49 = vmul.f32 %v1209_v27, %v233_v43 }
 0x14d   :  { %v923_v42 = vpop.eup %922  ;;  %v278_v52 = vadd.f32 %v1217_v39, %v255_v44 }
 0x14e   :  { %v925_v46 = vpop.eup %924  ;;  %v234_v24 = vmul.f32 %v923_v42, %v1171_v17  ;;  %v279_v48 = vadd.f32 %v1217_v39, %v256_v49 }
 0x14f   :  { %v235_v50 = vmul.f32 %v925_v46, %v1180_v35 }
 0x150   :  { %v927_v37 = vpop.eup %926  ;;  %v257_v11 = vmul.f32 %v1209_v27, %v234_v24 }
 0x151   :  { %v929_v51 = vpop.eup %928  ;;  %v236_v23 = vmul.f32 %v927_v37, %v1183_v21  ;;  %v258_v45 = vmul.f32 %v1209_v27, %v235_v50 }
 0x152   :  { %874 = vmatpush3.bf16.xpose.msk.msra.mxu0 %vm1226_vm1, %v869_v1  ;;  %v237_v29 = vmul.f32 %v929_v51, %v1192_v47  ;;  %v280_v17 = vadd.f32 %v1217_v39, %v257_v11 }
 0x153   :  { %877 = vmatprep.subr.msk.bf16.mxu0 %vm1226_vm1, %v875_v20  ;;  %v259_v35 = vmul.f32 %v1209_v27, %v236_v23  ;;  %v281_v56 = vadd.f32 %v1217_v39, %v258_v45 }
 0x154   :  { %v931_v28 = vpop.eup %930  ;;  %v260_v21 = vmul.f32 %v1209_v27, %v237_v29 }
 0x155   :  { %v238_v53 = vmul.f32 %v931_v28, %v1195_v25  ;;  %v282_v47 = vadd.f32 %v1217_v39, %v259_v35 }
 0x156   :  { %v283_v54 = vadd.f32 %v1217_v39, %v260_v21 }
 0x157   :  { %v261_v57 = vmul.f32 %v1209_v27, %v238_v53 }
 0x159   :  { %v284_v25 = vadd.f32 %v1217_v39, %v261_v57 }
 0x15a   :  { %880 = vmatpush3.bf16.xpose.msk.msra.mxu0 %vm1226_vm1, %v875_v20 }
 0x161   :  { %818 = vmatmul.mubr.msk.f32.vlgmr.msra.gmra.mrb[0].mxu0 %vm37_vm0, %v278_v52 }
 0x162   :  { %820 = vmatprep.mubr.msk.f32.mxu0 %vm37_vm0, %v279_v48 }
 0x165   :  { %821 = vmatmul.mubr.msk.f32.gmra.mrb[2].mxu0 %vm37_vm0, %v280_v17 }
 0x166   :  { %823 = vmatprep.mubr.msk.f32.mxu0 %vm37_vm0, %v281_v56 }
 0x169   :  { %824 = vmatmul.mubr.msk.f32.gmra.mrb[4].mxu0 %vm37_vm0, %v282_v47 }
 0x16a   :  { %826 = vmatprep.mubr.msk.f32.mxu0 %vm37_vm0, %v283_v54 }
 0x16d   :  { %827 = vmatmul.mubr.msk.f32.gmra.mrb[6].mxu0 %vm37_vm0, %v284_v25 }
 0x234   :  { %v819_v58 = vpop.f32.mrb[0].mxu0 }
 0x235   :  { %v447_v59 = vmul.f32 0.125, %v819_v58  ;;  %v407_v60 = vpop.f32.mrb[1].mxu0  ;;  %v582_v58 = vld [vmem:[%s1413_s4] sm:$0xff] }
 0x236   :  { %v446_v61 = vmul.f32 0.125, %v407_v60 }
 0x237   :  { %v457_v55 = vsel %vm37_vm0, %v447_v59, -inf }
 0x238   :  { %458 = vmax.xlane.f32.xlu1 %v457_v55  ;;  %v822_v62 = vpop.f32.mrb[2].mxu0  ;;  %v454_v27 = vsel %vm37_vm0, %v446_v61, -inf  ;;  %v585_v55 = vld [vmem:[%s1413_s4 + $0x18] sm:$0xff] }
 0x239   :  { %v449_v63 = vmul.f32 0.125, %v822_v62  ;;  %455 = vmax.xlane.f32.xlu0 %v454_v27  ;;  %v417_v2 = vpop.f32.mrb[3].mxu0  ;;  %v586_v27 = vld [vmem:[%s1413_s4 + $0x20] sm:$0xff] }
 0x23a   :  { %v448_v3 = vmul.f32 0.125, %v417_v2 }
 0x23b   :  { %v463_v4 = vsel %vm37_vm0, %v449_v63, -inf }
 0x23c   :  { %464 = vmax.xlane.f32.xlu1 %v463_v4  ;;  %v825_v39 = vpop.f32.mrb[4].mxu0  ;;  %v460_v5 = vsel %vm37_vm0, %v448_v3, -inf  ;;  %v589_v4 = vld [vmem:[%s1413_s4 + $0x38] sm:$0xff] }
 0x23d   :  { %v451_v6 = vmul.f32 0.125, %v825_v39  ;;  %461 = vmax.xlane.f32.xlu0 %v460_v5  ;;  %v427_v7 = vpop.f32.mrb[5].mxu0 }
 0x23e   :  { %v450_v8 = vmul.f32 0.125, %v427_v7 }
 0x23f   :  { %v469_v9 = vsel %vm37_vm0, %v451_v6, -inf }
 0x240   :  { %470 = vmax.xlane.f32.xlu1 %v469_v9  ;;  %v828_v12 = vpop.f32.mrb[6].mxu0  ;;  %v466_v13 = vsel %vm37_vm0, %v450_v8, -inf }
 0x241   :  { %v453_v14 = vmul.f32 0.125, %v828_v12  ;;  %467 = vmax.xlane.f32.xlu0 %v466_v13  ;;  %v437_v1 = vpop.f32.mrb[7].mxu0 }
 0x242   :  { %v452_v15 = vmul.f32 0.125, %v437_v1 }
 0x243   :  { %v475_v18 = vsel %vm37_vm0, %v453_v14, -inf }
 0x244   :  { %476 = vmax.xlane.f32.xlu1 %v475_v18  ;;  %v472_v19 = vsel %vm37_vm0, %v452_v15, -inf }
 0x245   :  { %473 = vmax.xlane.f32.xlu0 %v472_v19 }
 0x2c5   :  { %v459_v10 = vpop.xlane.xlu1 %458 }
 0x2c6   :  { %v479_v0 = vsub.f32 %v447_v59, %v459_v10  ;;  %v456_v22 = vpop.xlane.xlu0 %455  ;;  %v583_v59 = vld [vmem:[%s1413_s4 + $0x8] sm:$0xff]  ;;  %v550_v10 = vld [vmem:[%s1412_s3] sm:$0xff] }
 0x2c7   :  { %v478_v16 = vsub.f32 %v446_v61, %v456_v22  ;;  %v881_v60 = vpack.c.bf16 %v583_v59, %v582_v58  ;;  %v584_v61 = vld [vmem:[%s1413_s4 + $0x10] sm:$0xff]  ;;  %v551_v22 = vld [vmem:[%s1412_s3 + $0x8] sm:$0xff]  ;;  %vm558_vm2 = vcmp.lt.u32.totalorder %v550_v10, 3865470566 }
 0x2c8   :  { %v488_v26 = vmul.f32 1.442695, %v479_v0  ;;  %v885_v62 = vpack.c.bf16 %v585_v55, %v584_v61  ;;  %vm559_vm3 = vcmp.lt.u32.totalorder %v551_v22, 3865470566 }
 0x2c9   :  { %v486_v30 = vmul.f32 1.442695, %v478_v16  ;;  %v465_v31 = vpop.xlane.xlu1 %464  ;;  %882 = vmatprep.subr.bf16.mxu1 %v881_v60 }
 0x2ca   :  { %932 = vpow2.f32 %v488_v26  ;;  %v481_v32 = vsub.f32 %v449_v63, %v465_v31  ;;  %v462_v33 = vpop.xlane.xlu0 %461  ;;  %884 = vmatpush3.bf16.msra.mxu1 %v881_v60  ;;  %v587_v63 = vld [vmem:[%s1413_s4 + $0x28] sm:$0xff] }
 0x2cb   :  { %934 = vpow2.f32 %v486_v30  ;;  %v480_v34 = vsub.f32 %v448_v3, %v462_v33  ;;  %886 = vmatprep.subr.bf16.mxu1 %v885_v62  ;;  %v889_v2 = vpack.c.bf16 %v587_v63, %v586_v27  ;;  %v588_v3 = vld [vmem:[%s1413_s4 + $0x30] sm:$0xff] }
 0x2cc   :  { %v492_v20 = vmul.f32 1.442695, %v481_v32  ;;  %v893_v39 = vpack.c.bf16 %v589_v4, %v588_v3 }
 0x2cd   :  { %v490_v38 = vmul.f32 1.442695, %v480_v34  ;;  %v471_v36 = vpop.xlane.xlu1 %470 }
 0x2ce   :  { %936 = vpow2.f32 %v492_v20  ;;  %v483_v40 = vsub.f32 %v451_v6, %v471_v36  ;;  %v468_v41 = vpop.xlane.xlu0 %467  ;;  %888 = vmatpush3.bf16.msra.mxu1 %v885_v62  ;;  %v552_v20 = vld [vmem:[%s1412_s3 + $0x10] sm:$0xff] }
 0x2cf   :  { %938 = vpow2.f32 %v490_v38  ;;  %v482_v42 = vsub.f32 %v450_v8, %v468_v41  ;;  %890 = vmatprep.subr.bf16.mxu1 %v889_v2  ;;  %v553_v38 = vld [vmem:[%s1412_s3 + $0x18] sm:$0xff]  ;;  %vm560_vm4 = vcmp.lt.u32.totalorder %v552_v20, 3865470566 }
 0x2d0   :  { %v496_v43 = vmul.f32 1.442695, %v483_v40  ;;  %vm561_vm5 = vcmp.lt.u32.totalorder %v553_v38, 3865470566 }
 0x2d1   :  { %v494_v46 = vmul.f32 1.442695, %v482_v42  ;;  %v477_v44 = vpop.xlane.xlu1 %476 }
 0x2d2   :  { %940 = vpow2.f32 %v496_v43  ;;  %v485_v24 = vsub.f32 %v453_v14, %v477_v44  ;;  %v474_v37 = vpop.xlane.xlu0 %473  ;;  %892 = vmatpush3.bf16.msra.mxu1 %v889_v2  ;;  %v554_v44 = vld [vmem:[%s1412_s3 + $0x20] sm:$0xff] }
 0x2d3   :  { %942 = vpow2.f32 %v494_v46  ;;  %v484_v49 = vsub.f32 %v452_v15, %v474_v37  ;;  %894 = vmatprep.subr.bf16.mxu1 %v893_v39  ;;  %vm562_vm6 = vcmp.lt.u32.totalorder %v554_v44, 3865470566 }
 0x2d4   :  { %v1301_v50 = vpop.eup %932  ;;  %v500_v51 = vmul.f32 1.442695, %v485_v24  ;;  %v555_v24 = vld [vmem:[%s1412_s3 + $0x28] sm:$0xff] }
 0x2d5   :  { %v1303_v52 = vpop.eup %934  ;;  %v498_v11 = vmul.f32 1.442695, %v484_v49  ;;  %v505_v23 = vsel %vm37_vm0, %v1301_v50, 0.0  ;;  %vm563_vm7 = vcmp.lt.u32.totalorder %v555_v24, 3865470566 }
 0x2d6   :  { %944 = vpow2.f32 %v500_v51  ;;  %506 = vadd.xlane.f32.xlu1 %v505_v23  ;;  %v502_v28 = vsel %vm37_vm0, %v1303_v52, 0.0  ;;  %896 = vmatpush3.bf16.msra.mxu1 %v893_v39  ;;  %v556_v23 = vld [vmem:[%s1412_s3 + $0x30] sm:$0xff] }
 0x2d7   :  { %946 = vpow2.f32 %v498_v11  ;;  %503 = vadd.xlane.f32.xlu0 %v502_v28  ;;  %v557_v28 = vld [vmem:[%s1412_s3 + $0x38] sm:$0xff]  ;;  %vm564_vm8 = vcmp.lt.u32.totalorder %v556_v23, 3865470566  ;;  %s988_s3 = smov [#allocation2]  }
 0x2d8   :  { %v1309_v48 = vpop.eup %936  ;;  %vm565_vm9 = vcmp.lt.u32.totalorder %v557_v28, 3865470566  ;;  %s732_s29 = sshll.u32 %s988_s3, 4  ;;  %s733_s29 = int_to_ptr.vmem [resolvable:$true] %s732_s29 }
 0x2d9   :  { %v1311_v45 = vpop.eup %938  ;;  %v511_v29 = vsel %vm37_vm0, %v1309_v48, 0.0  ;;  %s964_s30 = scalar_lea.vmem %s733_s29, 1024  ;;  %p969_p1 = scmp.lt.s32.totalorder %s733_s29, %s733_s29 }
 0x2da   :  { %512 = vadd.xlane.f32.xlu1 %v511_v29  ;;  %v508_v17 = vsel %vm37_vm0, %v1311_v45, 0.0  ;;  %p965_p0 = scmp.ne.s32.totalorder %s733_s29, %s964_s30  ;;  %p970_p2 = scmp.lt.s32.totalorder %s964_s30, %s964_s30 }
 0x2db   :  { %509 = vadd.xlane.f32.xlu0 %v508_v17 }
 0x2dc   :  { %v1317_v35 = vpop.eup %940  ;;  %p971_p3 = por %p970_p2, %p969_p1 }
 0x2dd   :  { %v1319_v53 = vpop.eup %942  ;;  %v517_v56 = vsel %vm37_vm0, %v1317_v35, 0.0 }
 0x2de   :  { %518 = vadd.xlane.f32.xlu1 %v517_v56  ;;  %v514_v21 = vsel %vm37_vm0, %v1319_v53, 0.0  ;;  %p972_p4 = pnand %p971_p3, %p965_p0 }
 0x2df   :  { %515 = vadd.xlane.f32.xlu0 %v514_v21 }
 0x2e0   :  { %v1325_v47 = vpop.eup %944 }
 0x2e1   :  { %v1327_v57 = vpop.eup %946  ;;  %v523_v54 = vsel %vm37_vm0, %v1325_v47, 0.0 }
 0x2e2   :  { %524 = vadd.xlane.f32.xlu1 %v523_v54  ;;  %v520_v25 = vsel %vm37_vm0, %v1327_v57, 0.0 }
 0x2e3   :  { %521 = vadd.xlane.f32.xlu0 %v520_v25 }
 0x363   :  { %v507_v5 = vpop.xlane.xlu1 %506 }
 0x364   :  { %v527_v6 = vmul.f32 0.9, %v507_v5  ;;  %v504_v7 = vpop.xlane.xlu0 %503 }
 0x365   :  { %v526_v8 = vmul.f32 0.9, %v504_v7 }
 0x366   :  { %948 = vrcp.f32 %v527_v6 }
 0x367   :  { %950 = vrcp.f32 %v526_v8  ;;  %v513_v9 = vpop.xlane.xlu1 %512 }
 0x368   :  { %v529_v12 = vmul.f32 0.9, %v513_v9  ;;  %v510_v13 = vpop.xlane.xlu0 %509 }
 0x369   :  { %v528_v14 = vmul.f32 0.9, %v510_v13 }
 0x36a   :  { %952 = vrcp.f32 %v529_v12 }
 0x36b   :  { %954 = vrcp.f32 %v528_v14  ;;  %v519_v1 = vpop.xlane.xlu1 %518 }
 0x36c   :  { %v531_v15 = vmul.f32 0.9, %v519_v1  ;;  %v516_v18 = vpop.xlane.xlu0 %515 }
 0x36d   :  { %v530_v19 = vmul.f32 0.9, %v516_v18 }
 0x36e   :  { %956 = vrcp.f32 %v531_v15 }
 0x36f   :  { %958 = vrcp.f32 %v530_v19  ;;  %v525_v0 = vpop.xlane.xlu1 %524 }
 0x370   :  { %v949_v16 = vpop.eup %948  ;;  %v533_v26 = vmul.f32 0.9, %v525_v0  ;;  %v522_v30 = vpop.xlane.xlu0 %521 }
 0x371   :  { %v951_v31 = vpop.eup %950  ;;  %v532_v32 = vmul.f32 0.9, %v522_v30  ;;  %v567_v33 = vmul.f32 %v949_v16, %v1301_v50 }
 0x372   :  { %960 = vrcp.f32 %v533_v26  ;;  %v566_v34 = vmul.f32 %v951_v31, %v1303_v52 }
 0x373   :  { %962 = vrcp.f32 %v532_v32  ;;  %v575_v42 = vsel %vm559_vm3, %v567_v33, 0.0 }
 0x374   :  { %v953_v36 = vpop.eup %952  ;;  %v574_v40 = vsel %vm558_vm2, %v566_v34, 0.0 }
 0x375   :  { %v955_v41 = vpop.eup %954  ;;  %845 = vmatprep.mubr.msk.f32.mxu1 %vm37_vm0, %v574_v40  ;;  %v569_v43 = vmul.f32 %v953_v36, %v1309_v48 }
 0x376   :  { %846 = vmatmul.mubr.msk.f32.vlgmr.msra.gmra.mrb[0].mxu1 %vm37_vm0, %v575_v42  ;;  %v568_v46 = vmul.f32 %v955_v41, %v1311_v45 }
 0x377   :  { %v577_v51 = vsel %vm561_vm5, %v569_v43, 0.0 }
 0x378   :  { %v957_v37 = vpop.eup %956  ;;  %v576_v49 = vsel %vm560_vm4, %v568_v46, 0.0 }
 0x379   :  { %v959_v50 = vpop.eup %958  ;;  %848 = vmatprep.mubr.msk.f32.mxu1 %vm37_vm0, %v576_v49  ;;  %v571_v52 = vmul.f32 %v957_v37, %v1317_v35 }
 0x37a   :  { %849 = vmatmul.mubr.msk.f32.gmra.mrb[2].mxu1 %vm37_vm0, %v577_v51  ;;  %v570_v11 = vmul.f32 %v959_v50, %v1319_v53 }
 0x37b   :  { %v579_v17 = vsel %vm563_vm7, %v571_v52, 0.0 }
 0x37c   :  { %v961_v48 = vpop.eup %960  ;;  %v578_v45 = vsel %vm562_vm6, %v570_v11, 0.0 }
 0x37d   :  { %v963_v29 = vpop.eup %962  ;;  %851 = vmatprep.mubr.msk.f32.mxu1 %vm37_vm0, %v578_v45  ;;  %v573_v35 = vmul.f32 %v961_v48, %v1325_v47 }
 0x37e   :  { %852 = vmatmul.mubr.msk.f32.gmra.mrb[4].mxu1 %vm37_vm0, %v579_v17  ;;  %v572_v53 = vmul.f32 %v963_v29, %v1327_v57 }
 0x37f   :  { %v581_v21 = vsel %vm565_vm9, %v573_v35, 0.0 }
 0x380   :  { %v580_v56 = vsel %vm564_vm8, %v572_v53, 0.0 }
 0x381   :  { %854 = vmatprep.mubr.msk.f32.mxu1 %vm37_vm0, %v580_v56 }
 0x382   :  { %855 = vmatmul.mubr.msk.f32.gmra.mrb[6].mxu1 %vm37_vm0, %v581_v21 }
 0x449   :  { %v847_v54 = vpop.f32.mrb[0].mxu1 }
 0x44a   :  { %720 = vst [vmem:[#allocation2 + $0x8] sm:$0xff] %v847_v54  ;;  %v680_v25 = vpop.f32.mrb[1].mxu1 }
 0x44b   :  { %719 = vst [vmem:[#allocation2] sm:$0xff] %v680_v25 }
 0x44d   :  { %v850_v58 = vpop.f32.mrb[2].mxu1 }
 0x44e   :  { %722 = vst [vmem:[#allocation2 + $0x18] sm:$0xff] %v850_v58  ;;  %v690_v59 = vpop.f32.mrb[3].mxu1 }
 0x44f   :  { %721 = vst [vmem:[#allocation2 + $0x10] sm:$0xff] %v690_v59 }
 0x451   :  { %v853_v47 = vpop.f32.mrb[4].mxu1 }
 0x452   :  { %724 = vst [vmem:[#allocation2 + $0x28] sm:$0xff] %v853_v47  ;;  %v700_v60 = vpop.f32.mrb[5].mxu1 }
 0x453   :  { %723 = vst [vmem:[#allocation2 + $0x20] sm:$0xff] %v700_v60 }
 0x455   :  { %v856_v57 = vpop.f32.mrb[6].mxu1 }
 0x456   :  { %726 = vst [vmem:[#allocation2 + $0x38] sm:$0xff] %v856_v57  ;;  %v710_v61 = vpop.f32.mrb[7].mxu1 }
 0x457   :  { %725 = vst [vmem:[#allocation2 + $0x30] sm:$0xff] %v710_v61 }
 0x458   :  { %975 = shalt.err (!%p972_p4)
}
 0x459   :  { %s976_s8 = scalar_lea.hbm %s1414_s5, 1024 }
 0x45a   :  { %p977_p5 = scmp.ne.s32.totalorder %s1414_s5, %s976_s8  ;;  %p980_p6 = scmp.lt.u32.totalorder %s976_s8, %s1414_s5 }
 0x45c   :  { %p982_p7 = pnand %p980_p6, %p977_p5 }
 0x45e   :  { %985 = shalt.err (!%p982_p7)
}
 0x45f   :  { %s989_s13 = smov 128   ;;  %s990_s14 = smov 8  }
 0x460   :  { %738 = dma.vmem_to_hbm [thread:$0]  %s733_s29, 1024, %s1414_s5, [#allocation3], %s989_s13, %s989_s13, %s990_s14  }
 0x461   :  { %986 = dma.done.wait [#allocation3], 1024  }
 0x462   :  { %987 = vsyncadd [#allocation3], 4294966272 }
 0x463   :  { %742 = vsyncpa [#allocation3], 1 }

</bundles_post_ra>
